<compile_context>
chip_gen: v7x
topology: tpu7x:2x2x1
jax: 0.10.0
libtpu: 0.0.40
codegen_flags: <defaults>
</compile_context>

<pallas_src>
import functools
import math

import jax
import jax.numpy as jnp
from jax import lax
from jax.experimental import pallas as pl
from jax.experimental.pallas import tpu as pltpu

_LANE = 128


# --------------------------------- kernel -----------------------------------


def _mlp_kernel(x_ref, w1_ref, b1_ref, w2_ref, b2_ref, w3_ref, b3_ref, out_ref,
                *, chunk, num_chunks, compute_dtype):
    """One batch tile of the 3-layer MLP, transposed so batch is the lane axis.

    Shapes inside the kernel (TB = batch tile, processed in `chunk`-col pieces):
      x_ref : (input_dims, TB)       w1_ref: (fc1, input_dims)  b1_ref: (fc1, 1)
      h1    : (fc1, chunk)           w2_ref: (fc2, fc1)         b2_ref: (fc2, 1)
      h2    : (fc2, chunk)           w3_ref: (out, fc2)         b3_ref: (out, 1)
      out   : (out, TB)
    Matmuls accumulate in float32 on the MXU; tanh runs in `compute_dtype`
    on the EUP (f32 by default, bf16 recommended on v6e/v7x).
    """
    # Hoist the tiny weight/bias loads out of the chunk loop (stay in vregs).
    w1 = w1_ref[...]
    b1 = b1_ref[...]
    w2 = w2_ref[...]
    b2 = b2_ref[...]
    w3 = w3_ref[...]
    b3 = b3_ref[...]

    def body(c, carry):
        off = pl.multiple_of(c * chunk, chunk)

        xc = x_ref[:, pl.ds(off, chunk)].astype(compute_dtype)

        h = jnp.dot(w1, xc, preferred_element_type=jnp.float32) + b1
        h = jnp.tanh(h.astype(compute_dtype))

        h = jnp.dot(w2, h, preferred_element_type=jnp.float32) + b2
        h = jnp.tanh(h.astype(compute_dtype))

        h = jnp.dot(w3, h, preferred_element_type=jnp.float32) + b3

        out_ref[:, pl.ds(off, chunk)] = h.astype(out_ref.dtype)
        return carry

    lax.fori_loop(0, num_chunks, body, 0)


# --------------------------------- wrapper -----------------------------------


def feedforward_net_forward(
    x,
    params,
    *,
    block_batch=32768,
    chunk_cols=512,
    stream_dtype=jnp.float32,
    compute_dtype=jnp.float32,
    min_pallas_batch=1024,
    vmem_limit_bytes=48 * 1024 * 1024,
    x_transposed=False,
):
    """Forward pass of the 3-layer tanh MLP.

    x: (batch, input_dims) float32  [or (input_dims, batch) if x_transposed].
    params: dict with PyTorch-layout weights/biases:
        wN: (out_features, in_features), bN: (out_features, 1)  (float32).
    Returns (batch, out_dims) float32.

    stream_dtype : dtype of x as streamed from HBM (bandwidth lever).
    compute_dtype: dtype of weights / tanh / inter-layer activations
                   (EUP lever; matmul accumulation stays float32).
    """
    w1, b1 = params["w1"], params["b1"]
    w2, b2 = params["w2"], params["b2"]
    w3, b3 = params["w3"], params["b3"]

    if x_transposed:
        input_dims, batch = x.shape
    else:
        batch, input_dims = x.shape
    fc1_dims = w1.shape[0]
    fc2_dims = w2.shape[0]
    out_dims = w3.shape[0]

    # ---- small-batch fallback: the whole net is ~1 kFLOP/row; below a few
    # hundred rows custom-call dispatch + relayout dominate, let XLA fuse it.
    if batch < min_pallas_batch:
        xb = x.T if x_transposed else x
        h = jnp.tanh(xb @ w1.T + b1.T)
        h = jnp.tanh(h @ w2.T + b2.T)
        return h @ w3.T + b3.T

    # ---- batch tile selection --------------------------------------------
    padded_to_lane = pl.cdiv(batch, _LANE) * _LANE
    tb = min(block_batch, padded_to_lane)
    tb = max(_LANE, (tb // _LANE) * _LANE)

    # Guarantee >=2 grid steps when the batch allows it, so the "parallel"
    # grid axis actually uses both TensorCores on v7x.
    if tb >= padded_to_lane and padded_to_lane >= 2 * _LANE:
        tb = pl.cdiv(padded_to_lane // _LANE, 2) * _LANE

    # Inner chunk size (keeps activations in vregs); tb must be a multiple.
    chunk = min(chunk_cols, tb)
    chunk = max(_LANE, (chunk // _LANE) * _LANE)
    tb = max(chunk, (tb // chunk) * chunk)
    num_chunks = tb // chunk

    padded_batch = pl.cdiv(batch, tb) * tb
    num_tiles = padded_batch // tb

    # ---- layout plumbing (fuses to one XLA copy under jit) -----------------
    xT = x if x_transposed else x.T                      # (input_dims, batch)
    xT = xT.astype(stream_dtype)
    if padded_batch != batch:
        xT = jnp.pad(xT, ((0, 0), (0, padded_batch - batch)))

    w1c = w1.astype(compute_dtype)
    w2c = w2.astype(compute_dtype)
    w3c = w3.astype(compute_dtype)
    b1f = b1.astype(jnp.float32)
    b2f = b2.astype(jnp.float32)
    b3f = b3.astype(jnp.float32)

    # ---- cost estimate for the pallas_call itself (scheduler hint) ---------
    flops = 2 * padded_batch * (
        input_dims * fc1_dims + fc1_dims * fc2_dims + fc2_dims * out_dims
    )
    transcendentals = padded_batch * (fc1_dims + fc2_dims)
    bytes_accessed = (
        xT.size * xT.dtype.itemsize
        + padded_batch * out_dims * 4
        + sum(a.size * a.dtype.itemsize for a in (w1c, w2c, w3c, b1f, b2f, b3f))
    )

    def _const_spec(shape):
        return pl.BlockSpec(shape, lambda i: (0,) * len(shape))

    kernel = functools.partial(
        _mlp_kernel, chunk=chunk, num_chunks=num_chunks, compute_dtype=compute_dtype
    )

    outT = pl.pallas_call(
        kernel,
        out_shape=jax.ShapeDtypeStruct((out_dims, padded_batch), jnp.float32),
        grid=(num_tiles,),
        in_specs=[
            pl.BlockSpec((input_dims, tb), lambda i: (0, i)),   # x tile streams
            _const_spec(w1c.shape),                             # weights/biases
            _const_spec(b1f.shape),                             # stay resident
            _const_spec(w2c.shape),
            _const_spec(b2f.shape),
            _const_spec(w3c.shape),
            _const_spec(b3f.shape),
        ],
        out_specs=pl.BlockSpec((out_dims, tb), lambda i: (0, i)),
        compiler_params=pltpu.CompilerParams(
            dimension_semantics=("parallel",),      # megacore sharding on v7x
            vmem_limit_bytes=vmem_limit_bytes,      # <48 MiB: safe on 64 MiB v7x
        ),
        cost_estimate=pl.CostEstimate(
            flops=flops,
            transcendentals=transcendentals,
            bytes_accessed=bytes_accessed,
        ),
    )(xT, w1c, b1f, w2c, b2f, w3c, b3f)

    # back to (batch, out_dims), dropping batch padding
    return outT[:, :batch].T


# ------------------------------- init / reference ---------------------------


def _kaiming_uniform(key, fan_in, fan_out):
    """torch.nn.init.kaiming_uniform_ defaults (a=0): bound = sqrt(6 / fan_in).
    Returned in PyTorch (out_features, in_features) layout."""
    bound = math.sqrt(6.0 / fan_in)
    return jax.random.uniform(
        key, (fan_out, fan_in), dtype=jnp.float32, minval=-bound, maxval=bound
    )


def init_params(key, input_dims=3, fc1_dims=20, fc2_dims=20, out_dims=1):
    k1, k2, k3 = jax.random.split(key, 3)
    return {
        "w1": _kaiming_uniform(k1, input_dims, fc1_dims),
        "b1": jnp.zeros((fc1_dims, 1), jnp.float32),
        "w2": _kaiming_uniform(k2, fc1_dims, fc2_dims),
        "b2": jnp.zeros((fc2_dims, 1), jnp.float32),
        "w3": _kaiming_uniform(k3, fc2_dims, out_dims),
        "b3": jnp.zeros((out_dims, 1), jnp.float32),
    }


def _reference_forward(x, params):
    """Pure-JAX reference (standard nn.Linear semantics: x @ W.T + b)."""
    h = jnp.tanh(x @ params["w1"].T + params["b1"].T)
    h = jnp.tanh(h @ params["w2"].T + params["b2"].T)
    return h @ params["w3"].T + params["b3"].T


if __name__ == "__main__":
    key = jax.random.PRNGKey(0)
    pkey, xkey = jax.random.split(key)

    input_dims, fc1_dims, fc2_dims, out_dims = 3, 20, 20, 1
    # 2000 rows: exercises batch padding (2000 -> 2048), a 2-tile grid
    # (>=2 tiles for v7x megacore) and a 2-chunk inner loop per tile, while
    # staying well above the small-batch fallback threshold.
    batch = 2000

    params = init_params(pkey, input_dims, fc1_dims, fc2_dims, out_dims)
    x = jax.random.normal(xkey, (batch, input_dims), dtype=jnp.float32)

    # jit so the x relayout (transpose+cast+pad) fuses into a single XLA copy.
    fwd = jax.jit(functools.partial(feedforward_net_forward, params=params))
    out = jax.block_until_ready(fwd(x))

    ref = _reference_forward(x, params)
    assert out.shape == (batch, out_dims), out.shape
    assert jnp.allclose(out, ref, atol=1e-4, rtol=1e-5), "pallas path mismatch"

    # small-batch fallback path (pure JAX, no pallas_call dispatch overhead)
    xs = x[:7]
    out_small = jax.block_until_ready(feedforward_net_forward(xs, params))
    assert out_small.shape == (7, out_dims)
    assert jnp.allclose(out_small, _reference_forward(xs, params), atol=1e-5)

    print("KERNEL_OK")
</pallas_src>

<mosaic_0001>
module attributes {stable_mosaic.version = 11 : i64} {
  func.func @_mlp_kernel(%arg0: i32, %arg1: memref<3x1024xf32, #tpu.memory_space<vmem>>, %arg2: memref<20x3xf32, #tpu.memory_space<vmem>>, %arg3: memref<20x1xf32, #tpu.memory_space<vmem>>, %arg4: memref<20x20xf32, #tpu.memory_space<vmem>>, %arg5: memref<20x1xf32, #tpu.memory_space<vmem>>, %arg6: memref<1x20xf32, #tpu.memory_space<vmem>>, %arg7: memref<1x1xf32, #tpu.memory_space<vmem>>, %arg8: memref<1x1024xf32, #tpu.memory_space<vmem>>) attributes {dimension_semantics = [#tpu.dimension_semantics<parallel>], iteration_bounds = array<i64: 2>, scalar_prefetch = 0 : i64, scratch_operands = 0 : i64, tpu.core_type = #tpu.core_type<tc>, window_params = [{transform_indices = @transform_0, window_bounds = array<i64: 3, 1024>}, {pipeline_mode = #tpu.pipeline_mode<synchronous>, transform_indices = @transform_1, window_bounds = array<i64: 20, 3>}, {pipeline_mode = #tpu.pipeline_mode<synchronous>, transform_indices = @transform_2, window_bounds = array<i64: 20, 1>}, {pipeline_mode = #tpu.pipeline_mode<synchronous>, transform_indices = @transform_3, window_bounds = array<i64: 20, 20>}, {pipeline_mode = #tpu.pipeline_mode<synchronous>, transform_indices = @transform_4, window_bounds = array<i64: 20, 1>}, {pipeline_mode = #tpu.pipeline_mode<synchronous>, transform_indices = @transform_5, window_bounds = array<i64: 1, 20>}, {pipeline_mode = #tpu.pipeline_mode<synchronous>, transform_indices = @transform_6, window_bounds = array<i64: 1, 1>}, {transform_indices = @transform_7, window_bounds = array<i64: 1, 1024>}]} {
    %c0 = arith.constant 0 : index
    %c0_0 = arith.constant 0 : index
    %0 = vector.load %arg2[%c0, %c0_0] : memref<20x3xf32, #tpu.memory_space<vmem>>, vector<20x3xf32>
    %c0_1 = arith.constant 0 : index
    %c0_2 = arith.constant 0 : index
    %1 = vector.load %arg3[%c0_1, %c0_2] : memref<20x1xf32, #tpu.memory_space<vmem>>, vector<20x1xf32>
    %c0_3 = arith.constant 0 : index
    %c0_4 = arith.constant 0 : index
    %2 = vector.load %arg4[%c0_3, %c0_4] : memref<20x20xf32, #tpu.memory_space<vmem>>, vector<20x20xf32>
    %c0_5 = arith.constant 0 : index
    %c0_6 = arith.constant 0 : index
    %3 = vector.load %arg5[%c0_5, %c0_6] : memref<20x1xf32, #tpu.memory_space<vmem>>, vector<20x1xf32>
    %c0_7 = arith.constant 0 : index
    %c0_8 = arith.constant 0 : index
    %4 = vector.load %arg6[%c0_7, %c0_8] : memref<1x20xf32, #tpu.memory_space<vmem>>, vector<1x20xf32>
    %c0_9 = arith.constant 0 : index
    %c0_10 = arith.constant 0 : index
    %5 = vector.load %arg7[%c0_9, %c0_10] : memref<1x1xf32, #tpu.memory_space<vmem>>, vector<1x1xf32>
    %c0_i32 = arith.constant 0 : i32
    %c2_i32 = arith.constant 2 : i32
    %6 = arith.addi %c0_i32, %c2_i32 : i32
    %c1_i32 = arith.constant 1 : i32
    scf.for %arg9 = %c0_i32 to %6 step %c1_i32  : i32 {
      %c512_i32 = arith.constant 512 : i32
      %7 = arith.muli %arg9, %c512_i32 : i32
      %8 = tpu.assume_multiple %7, 512 : i32
      %c0_12 = arith.constant 0 : index
      %9 = arith.index_cast %8 : i32 to index
      %10 = vector.load %arg1[%c0_12, %9] : memref<3x1024xf32, #tpu.memory_space<vmem>>, vector<3x512xf32>
      %cst = arith.constant dense<0.000000e+00> : vector<20x512xf32>
      %11 = tpu.matmul %0, %10, %cst {dimension_numbers = #tpu.dot_dimension_numbers<[1], [0], [0], [1], [0, 0, 1, 1], [], []>} : vector<20x3xf32>, vector<3x512xf32>, vector<20x512xf32> -> vector<20x512xf32>
      %12 = vector.broadcast %1 : vector<20x1xf32> to vector<20x512xf32>
      %13 = arith.addf %11, %12 : vector<20x512xf32>
      %14 = math.tanh %13 : vector<20x512xf32>
      %cst_13 = arith.constant dense<0.000000e+00> : vector<20x512xf32>
      %15 = tpu.matmul %2, %14, %cst_13 {dimension_numbers = #tpu.dot_dimension_numbers<[1], [0], [0], [1], [0, 0, 1, 1], [], []>} : vector<20x20xf32>, vector<20x512xf32>, vector<20x512xf32> -> vector<20x512xf32>
      %16 = vector.broadcast %3 : vector<20x1xf32> to vector<20x512xf32>
      %17 = arith.addf %15, %16 : vector<20x512xf32>
      %18 = math.tanh %17 : vector<20x512xf32>
      %cst_14 = arith.constant dense<0.000000e+00> : vector<1x512xf32>
      %19 = tpu.matmul %4, %18, %cst_14 {dimension_numbers = #tpu.dot_dimension_numbers<[1], [0], [0], [1], [0, 0, 1, 1], [], []>} : vector<1x20xf32>, vector<20x512xf32>, vector<1x512xf32> -> vector<1x512xf32>
      %20 = vector.broadcast %5 : vector<1x1xf32> to vector<1x512xf32>
      %21 = arith.addf %19, %20 : vector<1x512xf32>
      %c0_15 = arith.constant 0 : index
      %22 = arith.index_cast %8 : i32 to index
      %23 = vector.load %arg8[%c0_15, %22] : memref<1x1024xf32, #tpu.memory_space<vmem>>, vector<1x512xf32>
      tpu.vector_store %arg8[%c0_15, %22], %21 {strides = array<i32>} : memref<1x1024xf32, #tpu.memory_space<vmem>>, vector<1x512xf32>,
    }
    %c2_i32_11 = arith.constant 2 : i32
    return
  }
  func.func @transform_0(%arg0: i32) -> (i32, i32) {
    %c0_i32 = arith.constant 0 : i32
    %c0_i32_0 = arith.constant 0 : i32
    return %c0_i32, %arg0 : i32, i32
  }
  func.func @transform_1(%arg0: i32) -> (i32, i32) {
    %c0_i32 = arith.constant 0 : i32
    %c0_i32_0 = arith.constant 0 : i32
    %c0_i32_1 = arith.constant 0 : i32
    return %c0_i32, %c0_i32_0 : i32, i32
  }
  func.func @transform_2(%arg0: i32) -> (i32, i32) {
    %c0_i32 = arith.constant 0 : i32
    %c0_i32_0 = arith.constant 0 : i32
    %c0_i32_1 = arith.constant 0 : i32
    return %c0_i32, %c0_i32_0 : i32, i32
  }
  func.func @transform_3(%arg0: i32) -> (i32, i32) {
    %c0_i32 = arith.constant 0 : i32
    %c0_i32_0 = arith.constant 0 : i32
    %c0_i32_1 = arith.constant 0 : i32
    return %c0_i32, %c0_i32_0 : i32, i32
  }
  func.func @transform_4(%arg0: i32) -> (i32, i32) {
    %c0_i32 = arith.constant 0 : i32
    %c0_i32_0 = arith.constant 0 : i32
    %c0_i32_1 = arith.constant 0 : i32
    return %c0_i32, %c0_i32_0 : i32, i32
  }
  func.func @transform_5(%arg0: i32) -> (i32, i32) {
    %c0_i32 = arith.constant 0 : i32
    %c0_i32_0 = arith.constant 0 : i32
    %c0_i32_1 = arith.constant 0 : i32
    return %c0_i32, %c0_i32_0 : i32, i32
  }
  func.func @transform_6(%arg0: i32) -> (i32, i32) {
    %c0_i32 = arith.constant 0 : i32
    %c0_i32_0 = arith.constant 0 : i32
    %c0_i32_1 = arith.constant 0 : i32
    return %c0_i32, %c0_i32_0 : i32, i32
  }
  func.func @transform_7(%arg0: i32) -> (i32, i32) {
    %c0_i32 = arith.constant 0 : i32
    %c0_i32_0 = arith.constant 0 : i32
    return %c0_i32, %arg0 : i32, i32
  }
}

</mosaic_0001>

<bundles_post_ra>
// kernel: feedforward_net_forward.1
= control target key start
LH: loop header
LB: loop body
LE: loop exit
PB: predicated region body
PF: predicated region fallthrough
CT: control target
= control target key end

     0   :  { %s1187_s26 = smov 0   ;;  %s1353_s0 = inlined_call_operand.vmem [shape: f32[3,2048], index: 0, kind: input, shape index: {}]   ;;  %s1354_s1 = inlined_call_operand.vmem [shape: f32[20,3], index: 1, kind: input, shape index: {}]   ;;  %s1355_s2 = inlined_call_operand.vmem [shape: f32[20,1], index: 2, kind: input, shape index: {}, may-alias: {2,4}]   ;;  %s1356_s3 = inlined_call_operand.vmem [shape: f32[20,20], index: 3, kind: input, shape index: {}]   ;;  %s1357_s4 = inlined_call_operand.vmem [shape: f32[20,1], index: 4, kind: input, shape index: {}, may-alias: {2,4}]   ;;  %s1358_s5 = inlined_call_operand.vmem [shape: f32[1,20], index: 5, kind: input, shape index: {}]   ;;  %s1359_s6 = inlined_call_operand.<no memory space> [shape: f32[1,1], index: 6, kind: input, shape index: {}]   ;;  %s1360_s7 = inlined_call_operand.vmem [shape: f32[1,2048], index: 7, kind: output, shape index: {}]  }
   0x1   :  { %v12_v0 = vstv %s1359_s6 }
   0x2   :  { %13 = vst [vmem:[#allocation2] sm:$0x1] %v12_v0 }
   0x3 LB: > { %s1000_s27 = sadd.s32 4294967295, %s1135_s26   ;;  %p1004_p0 = scmp.ge.s32.totalorder %s1135_s26, 1  ;;  %s1135_s26 = sphi %s1187_s26, %s19_s26  }
   0x4   : > { %p240_p1 = scmp.lt.s32.totalorder %s1135_s26, 3 }
   0x6   : > { %p241_p2 = pnand %p1004_p0, %p240_p1 }
   0x7   : > { %s1005_s28 = sshll.u32 (!%p241_p2), %s1000_s27, 3  ;;  %v1198_v1 = vld [vmem:[%s1354_s1] sm:$0xff] (!%p241_p2)  ;;  %v1203_v2 = vld [vmem:[%s1354_s1 + $0x8] sm:$0xff] (!%p241_p2)  ;;  %v1208_v3 = vld [vmem:[%s1354_s1 + $0x10] sm:$0xf] (!%p241_p2)  ;;  %s1274_s16 = smov (!%p241_p2), 0  }
   0x8   : > { %244 = sbr.rel (%p241_p2) target bundleno = 731 (0x2db), region = 48  ;;  %p272_p3 = scmp.lt.s32.totalorder (!%p241_p2), %s1005_s28, 15  ;;  %v1213_v4 = vld [vmem:[%s1355_s2] sm:$0xff] (!%p241_p2)  ;;  %v1218_v5 = vld [vmem:[%s1355_s2 + $0x8] sm:$0xff] (!%p241_p2)  ;;  %v1223_v6 = vld [vmem:[%s1355_s2 + $0x10] sm:$0xf] (!%p241_p2) }
   0x9   : > { %v1228_v7 = vld [vmem:[%s1356_s3] sm:$0xff] (!%p241_p2)  ;;  %v1233_v8 = vld [vmem:[%s1356_s3 + $0x8] sm:$0xff] (!%p241_p2)  ;;  %v1238_v9 = vld [vmem:[%s1356_s3 + $0x10] sm:$0xf] (!%p241_p2) }
   0xa   : > { %v1245_v10 = vld [vmem:[%s1357_s4] sm:$0xff] (!%p241_p2)  ;;  %v1250_v11 = vld [vmem:[%s1357_s4 + $0x8] sm:$0xff] (!%p241_p2)  ;;  %v1255_v12 = vld [vmem:[%s1357_s4 + $0x10] sm:$0xf] (!%p241_p2) }
   0xb   : > { %v1260_v13 = vld [vmem:[%s1358_s5] sm:$0x1] (!%p241_p2) }
   0xc   : > { %v1262_v14 = vld [vmem:[#allocation2] sm:$0x1] (!%p241_p2) }
   0xf   : > { %s1362_s28 = smov (!%p272_p3, %s1005_s28), 15 }
  0x10   : > { %s1006_s9 = sshll.u32 %s1362_s28, 2  ;;  %s280_s12 = scalar_lea.vmem %s1360_s7, %s1362_s28 }
  0x11   : > { %s1272_s15 = scalar_lea.vmem %s1353_s0, %s1006_s9 }
  0x12 LB: >> { %v1141_v15 = vmov 0.0   ;;  %s1008_s17 = sshll.u32 %s1139_s16, 9  ;;  %v1142_v16 = vmov 0   ;;  %vm338_vm0 = vcmask 1042432   ;;  %vm328_vm1 = vcmask 23552   ;;  %s301_s16 = sadd.s32 1, %s1139_s16   ;;  %s1139_s16 = sphi %s1274_s16, %s301_s16  }
  0x13   : >> { %411 = vmatprep.mubr.f32.mxu0 %v1141_v15  ;;  %494 = vmatprep.mubr.f32.mxu1 %v1141_v15  ;;  %s1282_s18 = sshra.s32 %s1008_s17, 7  ;;  %vm550_vm2 = vcmask 1043456   ;;  %vm540_vm3 = vcmask 162816   ;;  %p298_p4 = scmp.ge.s32.totalorder %s301_s16, 2  }
  0x14   : >> { %1073 = vset.pattern.permute.xlu0 %v1142_v16  ;;  %1074 = vset.pattern.permute.xlu1 %v1142_v16  ;;  %s1009_s19 = sshll.u32 %s1282_s18, 2  ;;  %s936_s23 = scalar_lea.vmem %s280_s12, %s1282_s18 }
  0x15   : >> { %311 = vperm.xlu0 %1073, %v1213_v4   ;;  %321 = vperm.xlu1 %1074, %v1223_v6   ;;  %s306_s20 = scalar_lea.vmem %s1272_s15, %s1009_s19 }
  0x16   : >> { %v307_v17 = vld [vmem:[%s306_s20] sm:$0x77]  ;;  %v308_v18 = vld [vmem:[%s306_s20 + $0x8] sm:$0x77] }
  0x17   : >> { %v326_v19 = vcombine.high %v307_v17, %v307_v17  ;;  %v327_v20 = vcombine.high %v308_v18, %v308_v18 }
  0x19   : >> { %316 = vperm.xlu0 %1073, %v1218_v5   ;;  %527 = vperm.xlu1 %1074, %v1245_v10  }
  0x1a   : >> { %1010 = vmatprep.subr.msk.mxu0 %vm338_vm0, %v326_v19  ;;  %1015 = vmatprep.subr.msk.mxu1 %vm338_vm0, %v327_v20 }
  0x1b   : >> { %1011 = vmatpush1.msk.msra.mxu0 %vm338_vm0, %v307_v17  ;;  %1016 = vmatpush1.msk.msra.mxu1 %vm338_vm0, %v308_v18 }
  0x1c   : >> { %1012 = vmatmul.mubr.msk.f32.vlgmr.msra.gmra.mrb[0].mxu0 %vm328_vm1, %v1198_v1  ;;  %1017 = vmatmul.mubr.msk.f32.vlgmr.msra.gmra.mrb[0].mxu1 %vm328_vm1, %v1198_v1 }
  0x1d   : >> { %417 = vmatprep.mubr.f32.mxu0 %v1141_v15  ;;  %500 = vmatprep.mubr.f32.mxu1 %v1141_v15 }
  0x1e   : >> { %532 = vperm.xlu0 %1073, %v1250_v11   ;;  %537 = vperm.xlu1 %1074, %v1255_v12  }
  0x20   : >> { %1013 = vmatmul.mubr.msk.f32.gmra.mrb[2].mxu0 %vm328_vm1, %v1203_v2  ;;  %1018 = vmatmul.mubr.msk.f32.gmra.mrb[2].mxu1 %vm328_vm1, %v1203_v2 }
  0x21   : >> { %423 = vmatprep.mubr.f32.mxu0 %v1141_v15  ;;  %506 = vmatprep.mubr.f32.mxu1 %v1141_v15 }
  0x22   : >> { %743 = vperm.xlu0 %1073, %v1262_v14  }
  0x24   : >> { %1014 = vmatmul.mubr.msk.f32.gmra.mrb[4].mxu0 %vm328_vm1, %v1208_v3  ;;  %1019 = vmatmul.mubr.msk.f32.gmra.mrb[4].mxu1 %vm328_vm1, %v1208_v3 }
  0x25   : >> { %627 = vmatprep.mubr.f32.mxu0 %v1141_v15  ;;  %710 = vmatprep.mubr.f32.mxu1 %v1141_v15 }
  0x94   : >> { %v312_v21 = vpop.permute.xlu0 %311  ;;  %v322_v39 = vpop.permute.xlu1 %321 }
  0x98   : >> { %v317_v30 = vpop.permute.xlu0 %316  ;;  %v528_v0 = vpop.permute.xlu1 %527 }
  0xef   : >> { %v413_v22 = vpop.f32.mrb[0].mxu0  ;;  %v496_v23 = vpop.f32.mrb[0].mxu1 }
  0xf0   : >> { %v414_v24 = vadd.f32 %v413_v22, %v312_v21  ;;  %v497_v25 = vadd.f32 %v496_v23, %v312_v21  ;;  %v415_v26 = vpop.f32.mrb[1].mxu0  ;;  %v498_v27 = vpop.f32.mrb[1].mxu1 }
  0xf1   : >> { %v416_v28 = vadd.f32 %v415_v26, %v312_v21  ;;  %v499_v29 = vadd.f32 %v498_v27, %v312_v21 }
  0xf2   : >> { %1077 = vtanh.f32 %v414_v24  ;;  %v533_v24 = vpop.permute.xlu0 %532 }
  0xf3   : >> { %1079 = vtanh.f32 %v497_v25  ;;  %v419_v31 = vpop.f32.mrb[2].mxu0  ;;  %v502_v32 = vpop.f32.mrb[2].mxu1 }
  0xf4   : >> { %1081 = vtanh.f32 %v416_v28  ;;  %v420_v33 = vadd.f32 %v419_v31, %v317_v30  ;;  %v503_v34 = vadd.f32 %v502_v32, %v317_v30  ;;  %v421_v35 = vpop.f32.mrb[3].mxu0  ;;  %v504_v36 = vpop.f32.mrb[3].mxu1 }
  0xf5   : >> { %1083 = vtanh.f32 %v499_v29  ;;  %v422_v37 = vadd.f32 %v421_v35, %v317_v30  ;;  %v505_v38 = vadd.f32 %v504_v36, %v317_v30  ;;  %v538_v32 = vpop.permute.xlu1 %537 }
  0xf6   : >> { %1085 = vtanh.f32 %v420_v33 }
  0xf7   : >> { %1087 = vtanh.f32 %v503_v34  ;;  %v425_v40 = vpop.f32.mrb[4].mxu0  ;;  %v508_v41 = vpop.f32.mrb[4].mxu1 }
  0xf8   : >> { %1089 = vtanh.f32 %v422_v37  ;;  %v427_v42 = vpop.f32.mrb[5].mxu0  ;;  %v510_v43 = vpop.f32.mrb[5].mxu1  ;;  %v426_v46 = vadd.f32 %v425_v40, %v322_v39  ;;  %v509_v48 = vadd.f32 %v508_v41, %v322_v39 }
  0xf9   : >> { %1091 = vtanh.f32 %v505_v38  ;;  %v428_v44 = vadd.f32 %v427_v42, %v322_v39  ;;  %v511_v45 = vadd.f32 %v510_v43, %v322_v39 }
  0xfb   : >> { %1093 = vtanh.f32 %v428_v44 }
  0xfc   : >> { %v1078_v47 = vpop.eup %1077  ;;  %1095 = vtanh.f32 %v511_v45 }
  0xfd   : >> { %v1080_v49 = vpop.eup %1079  ;;  %1097 = vtanh.f32 %v426_v46 }
  0xfe   : >> { %v1082_v50 = vpop.eup %1081  ;;  %1099 = vtanh.f32 %v509_v48 }
  0xff   : >> { %v1084_v51 = vpop.eup %1083 }
 0x100   : >> { %v1086_v52 = vpop.eup %1085 }
 0x101   : >> { %v1088_v53 = vpop.eup %1087  ;;  %v1040_v54 = vpack.c.bf16 %v1086_v52, %v1078_v47 }
 0x102   : >> { %v1090_v55 = vpop.eup %1089  ;;  %v1044_v56 = vpack.c.bf16 %v1088_v53, %v1080_v49 }
 0x103   : >> { %v1092_v57 = vpop.eup %1091  ;;  %v1038_v58 = vpack.c.bf16 %v1090_v55, %v1082_v50 }
 0x104   : >> { %v1042_v59 = vpack.c.bf16 %v1092_v57, %v1084_v51  ;;  %v746_v57 = vlaneseq }
 0x105   : >> { %1039 = vmatprep.subr.bf16.mxu0 %v1038_v58  ;;  %v1094_v60 = vpop.eup %1093 }
 0x106   : >> { %1043 = vmatprep.subr.bf16.mxu1 %v1042_v59  ;;  %1041 = vmatpush1.bf16.msra.mxu0 %v1040_v54  ;;  %v1096_v61 = vpop.eup %1095  ;;  %v747_v58 = vshrl.u32 %v746_v57, 7  ;;  %v1143_v59 = vmov 1966171168   ;;  %vm939_vm4 = vcmp.lt.s32.totalorder %v746_v57, 512 }
 0x107   : >> { %1045 = vmatpush1.bf16.msra.mxu1 %v1044_v56  ;;  %1020 = vmatprep.subr.msk.mxu0 %vm550_vm2, %v1094_v60  ;;  %v1098_v62 = vpop.eup %1097  ;;  %v914_v60 = vunpack.c.l.s4 %v1143_v59 }
 0x108   : >> { %1025 = vmatprep.subr.msk.mxu1 %vm550_vm2, %v1096_v61  ;;  %v1100_v63 = vpop.eup %1099  ;;  %v748_v61 = vsub.s32 0, %v747_v58 }
 0x10a   : >> { %1021 = vmatpush1.msk.msra.mxu0 %vm550_vm2, %v1098_v62  ;;  %v744_v62 = vpop.permute.xlu0 %743 }
 0x10b   : >> { %1026 = vmatpush1.msk.msra.mxu1 %vm550_vm2, %v1100_v63  ;;  %1022 = vmatmul.mubr.msk.f32.vlgmr.msra.gmra.mrb[6].mxu0 %vm540_vm3, %v1228_v7  ;;  %v915_v63 = vunpack.c.0.s8 %v914_v60 }
 0x10c   : >> { %1027 = vmatmul.mubr.msk.f32.vlgmr.msra.gmra.mrb[6].mxu1 %vm540_vm3, %v1228_v7  ;;  %633 = vmatprep.mubr.f32.mxu0 %v1141_v15 }
 0x10d   : >> { %716 = vmatprep.mubr.f32.mxu1 %v1141_v15 }
 0x10f   : >> { %1023 = vmatmul.mubr.msk.f32.gmra.mrb[8].mxu0 %vm540_vm3, %v1233_v8 }
 0x110   : >> { %1028 = vmatmul.mubr.msk.f32.gmra.mrb[8].mxu1 %vm540_vm3, %v1233_v8  ;;  %639 = vmatprep.mubr.f32.mxu0 %v1141_v15 }
 0x111   : >> { %722 = vmatprep.mubr.f32.mxu1 %v1141_v15 }
 0x113   : >> { %1024 = vmatmul.mubr.msk.f32.gmra.mrb[10].mxu0 %vm540_vm3, %v1238_v9 }
 0x114   : >> { %1029 = vmatmul.mubr.msk.f32.gmra.mrb[10].mxu1 %vm540_vm3, %v1238_v9  ;;  %829 = vmatprep.mubr.f32.mxu0 %v1141_v15 }
 0x115   : >> { %900 = vmatprep.mubr.f32.mxu1 %v1141_v15 }
 0x1de   : >> { %v629_v16 = vpop.f32.mrb[6].mxu0 }
 0x1df   : >> { %v630_v17 = vadd.f32 %v629_v16, %v528_v0  ;;  %v712_v18 = vpop.f32.mrb[6].mxu1  ;;  %v631_v19 = vpop.f32.mrb[7].mxu0 }
 0x1e0   : >> { %v713_v20 = vadd.f32 %v712_v18, %v528_v0  ;;  %v632_v21 = vadd.f32 %v631_v19, %v528_v0  ;;  %v714_v22 = vpop.f32.mrb[7].mxu1 }
 0x1e1   : >> { %1101 = vtanh.f32 %v630_v17  ;;  %v715_v23 = vadd.f32 %v714_v22, %v528_v0  ;;  %v749_v0 = vrot.slane %v744_v62, %v748_v61 }
 0x1e2   : >> { %1103 = vtanh.f32 %v713_v20  ;;  %v635_v25 = vpop.f32.mrb[8].mxu0  ;;  %v918_v20 = vsub.s32 %v915_v63, %v747_v58 }
 0x1e3   : >> { %1105 = vtanh.f32 %v632_v21  ;;  %v636_v26 = vadd.f32 %v635_v25, %v533_v24  ;;  %v718_v27 = vpop.f32.mrb[8].mxu1  ;;  %v637_v28 = vpop.f32.mrb[9].mxu0 }
 0x1e4   : >> { %1107 = vtanh.f32 %v715_v23  ;;  %v719_v29 = vadd.f32 %v718_v27, %v533_v24  ;;  %v638_v15 = vadd.f32 %v637_v28, %v533_v24  ;;  %v720_v30 = vpop.f32.mrb[9].mxu1 }
 0x1e5   : >> { %1109 = vtanh.f32 %v636_v26  ;;  %v721_v31 = vadd.f32 %v720_v30, %v533_v24 }
 0x1e6   : >> { %1111 = vtanh.f32 %v719_v29  ;;  %v641_v33 = vpop.f32.mrb[10].mxu0 }
 0x1e7   : >> { %1113 = vtanh.f32 %v638_v15  ;;  %v724_v34 = vpop.f32.mrb[10].mxu1  ;;  %v643_v35 = vpop.f32.mrb[11].mxu0  ;;  %v642_v39 = vadd.f32 %v641_v33, %v538_v32 }
 0x1e8   : >> { %1115 = vtanh.f32 %v721_v31  ;;  %v644_v36 = vadd.f32 %v643_v35, %v538_v32  ;;  %v726_v37 = vpop.f32.mrb[11].mxu1  ;;  %v725_v41 = vadd.f32 %v724_v34, %v538_v32 }
 0x1e9   : >> { %v727_v38 = vadd.f32 %v726_v37, %v538_v32 }
 0x1ea   : >> { %1117 = vtanh.f32 %v644_v36 }
 0x1eb   : >> { %v1102_v40 = vpop.eup %1101  ;;  %1119 = vtanh.f32 %v727_v38 }
 0x1ec   : >> { %v1104_v42 = vpop.eup %1103  ;;  %1121 = vtanh.f32 %v642_v39 }
 0x1ed   : >> { %v1106_v43 = vpop.eup %1105  ;;  %1123 = vtanh.f32 %v725_v41 }
 0x1ee   : >> { %v1108_v44 = vpop.eup %1107 }
 0x1ef   : >> { %v1110_v45 = vpop.eup %1109 }
 0x1f0   : >> { %v1112_v46 = vpop.eup %1111  ;;  %v1048_v47 = vpack.c.bf16 %v1110_v45, %v1102_v40 }
 0x1f1   : >> { %v1114_v48 = vpop.eup %1113  ;;  %v1052_v49 = vpack.c.bf16 %v1112_v46, %v1104_v42 }
 0x1f2   : >> { %v1116_v50 = vpop.eup %1115  ;;  %v1046_v51 = vpack.c.bf16 %v1114_v48, %v1106_v43 }
 0x1f3   : >> { %v1050_v52 = vpack.c.bf16 %v1116_v50, %v1108_v44 }
 0x1f4   : >> { %1047 = vmatprep.subr.bf16.mxu0 %v1046_v51  ;;  %v1118_v53 = vpop.eup %1117 }
 0x1f5   : >> { %1051 = vmatprep.subr.bf16.mxu1 %v1050_v52  ;;  %1049 = vmatpush1.bf16.msra.mxu0 %v1048_v47  ;;  %v1120_v54 = vpop.eup %1119 }
 0x1f6   : >> { %1053 = vmatpush1.bf16.msra.mxu1 %v1052_v49  ;;  %1030 = vmatprep.subr.msk.mxu0 %vm550_vm2, %v1118_v53  ;;  %v1122_v55 = vpop.eup %1121 }
 0x1f7   : >> { %1033 = vmatprep.subr.msk.mxu1 %vm550_vm2, %v1120_v54  ;;  %v1124_v56 = vpop.eup %1123 }
 0x1f9   : >> { %1031 = vmatpush1.msk.msra.mxu0 %vm550_vm2, %v1122_v55 }
 0x1fa   : >> { %1034 = vmatpush1.msk.msra.mxu1 %vm550_vm2, %v1124_v56  ;;  %1032 = vmatmul.mubr.msk.f32.vlgmr.msra.gmra.mrb[12].mxu0 %vm540_vm3, %v1260_v13 }
 0x1fb   : >> { %1035 = vmatmul.mubr.msk.f32.vlgmr.msra.gmra.mrb[12].mxu1 %vm540_vm3, %v1260_v13 }
 0x2cd   : >> { %v831_v16 = vpop.f32.mrb[12].mxu0 }
 0x2ce   : >> { %v832_v17 = vadd.f32 %v831_v16, %v749_v0  ;;  %v902_v18 = vpop.f32.mrb[12].mxu1  ;;  %v833_v19 = vpop.f32.mrb[13].mxu0 }
 0x2cf   : >> { %v903_v21 = vadd.f32 %v902_v18, %v749_v0  ;;  %v834_v22 = vadd.f32 %v833_v19, %v749_v0  ;;  %v904_v23 = vpop.f32.mrb[13].mxu1 }
 0x2d0   : >> { %v905_v24 = vadd.f32 %v904_v23, %v749_v0 }
 0x2d1   : >> { %v911_v25 = vcombine.low %v832_v17, %v834_v22 }
 0x2d2   : >> { %v912_v26 = vcombine.low %v903_v21, %v905_v24 }
 0x2d3   : >> { %v919_v27 = vrot.slane %v911_v25, %v918_v20 }
 0x2d4   : >> { %v926_v28 = vrot.slane %v912_v26, %v918_v20  ;;  %300 = sbr.rel (!%p298_p4) target bundleno = 18 (0x12), region = 87 }
 0x2d6   : >> { %v927_v29 = vcombine.low %v919_v27, %v926_v28 }
 0x2d8   : >> { %v934_v15 = vrot.slane %v927_v29, %v918_v20 }
 0x2da   : >> { %941 = vst.msk [vmem:[%s936_s23] sm:$0xf] %vm939_vm4, %v934_v15 }
 0x2db PF: > { %s19_s26 = sadd.s32 1, %s1135_s26  }
 0x2dc   : > { %p16_p5 = scmp.ge.s32.totalorder %s19_s26, 4  }
 0x2de   :  { %18 = sbr.rel (!%p16_p5) target bundleno = 3 (0x3), region = 98 }

</bundles_post_ra>
